<compile_context>
chip_gen: v6e
topology: v6e:2x2x1
jax: 0.10.0
libtpu: 0.0.40
codegen_flags: <defaults>
</compile_context>

<pallas_src>
import functools

import jax
import jax.numpy as jnp
from jax import lax
from jax.experimental import pallas as pl
from jax.experimental.pallas import tpu as pltpu


def vit_output_kernel(x_ref, w_ref, b_ref, o_ref, acc_ref):
    """One (tm x tn) output tile, accumulated over the K (intermediate) axis."""
    k = pl.program_id(2)

    @pl.when(k == 0)
    def _():
        acc_ref[...] = jnp.zeros_like(acc_ref)

    acc_ref[...] += jnp.dot(
        x_ref[...], w_ref[...], preferred_element_type=jnp.float32
    )

    @pl.when(k == pl.num_programs(2) - 1)
    def _():
        # Bias add + (identity) dropout on the final reduction step.
        o_ref[...] = (acc_ref[...] + b_ref[...]).astype(o_ref.dtype)


def vit_output(x, w, b, *, tm=16, tn=128, tk=128, matmul_dtype=None):
    """ViTOutput forward.

    x: (B, S, I) activations   (I = intermediate_size)
    w: (I, D) weight, pre-transposed from PyTorch's (D, I)
    b: (D,)  bias
    returns: (B, S, D) float32
    """
    B_, S_, I_ = x.shape
    I2, D_ = w.shape
    assert I_ == I2 and b.shape == (D_,)

    M = B_ * S_
    assert M % tm == 0 and D_ % tn == 0 and I_ % tk == 0

    # Fold batch & sequence into the matmul M dimension.
    x2 = x.reshape(M, I_)
    if matmul_dtype is not None:
        # bf16 operands, f32 accumulation (v6e/v7x MXU feedback).
        x2 = x2.astype(matmul_dtype)
        w = w.astype(matmul_dtype)
    b2 = b.reshape(1, D_).astype(jnp.float32)

    grid = (M // tm, D_ // tn, I_ // tk)

    out = pl.pallas_call(
        vit_output_kernel,
        out_shape=jax.ShapeDtypeStruct((M, D_), jnp.float32),
        grid_spec=pltpu.PrefetchScalarGridSpec(
            num_scalar_prefetch=0,
            grid=grid,
            in_specs=[
                pl.BlockSpec((tm, tk), lambda i, j, k: (i, k)),   # activations
                pl.BlockSpec((tk, tn), lambda i, j, k: (k, j)),   # weight
                pl.BlockSpec((1, tn), lambda i, j, k: (0, j)),    # bias
            ],
            out_specs=pl.BlockSpec((tm, tn), lambda i, j, k: (i, j)),
            scratch_shapes=[pltpu.VMEM((tm, tn), jnp.float32)],
        ),
        compiler_params=pltpu.CompilerParams(
            dimension_semantics=("parallel", "parallel", "arbitrary"),
        ),
    )(x2, w, b2)

    return out.reshape(B_, S_, D_)


def vit_output_ref(x, w, b):
    """Pure-JAX reference (dropout = identity)."""
    B_, S_, I_ = x.shape
    y = jnp.dot(
        x.reshape(-1, I_), w, precision=lax.Precision.HIGHEST
    ) + b
    return y.reshape(B_, S_, w.shape[1])


if __name__ == "__main__":
    # Small shapes consistent with the module: (batch, patches, intermediate),
    # keeping the 4:1 intermediate:hidden ratio of the real ViT config.
    B, S, I, D = 2, 8, 256, 128

    key = jax.random.PRNGKey(0)
    kx, kw, kb = jax.random.split(key, 3)
    x = jax.random.normal(kx, (B, S, I), jnp.float32)
    w = 0.02 * jax.random.normal(kw, (I, D), jnp.float32)   # (in, out) layout
    b = 0.02 * jax.random.normal(kb, (D,), jnp.float32)

    ref = vit_output_ref(x, w, b)

    # f32 path.
    out = jax.block_until_ready(vit_output(x, w, b))
    assert out.shape == (B, S, D)
    assert jnp.allclose(out, ref, atol=1e-3, rtol=1e-3), float(
        jnp.max(jnp.abs(out - ref))
    )

    # bf16-operand path (f32 accumulate) — per v6e/v7x feedback, looser tol.
    out_bf16 = jax.block_until_ready(vit_output(x, w, b, matmul_dtype=jnp.bfloat16))
    assert jnp.allclose(out_bf16, ref, atol=3e-2, rtol=3e-2), float(
        jnp.max(jnp.abs(out_bf16 - ref))
    )

    print("KERNEL_OK")
</pallas_src>

<mosaic_0001>
module attributes {stable_mosaic.version = 11 : i64} {
  func.func @vit_output_kernel(%arg0: i32, %arg1: i32, %arg2: i32, %arg3: memref<16x128xf32, #tpu.memory_space<vmem>>, %arg4: memref<128x128xf32, #tpu.memory_space<vmem>>, %arg5: memref<1x128xf32, #tpu.memory_space<vmem>>, %arg6: memref<16x128xf32, #tpu.memory_space<vmem>>, %arg7: memref<16x128xf32, #tpu.memory_space<vmem>>) attributes {dimension_semantics = [#tpu.dimension_semantics<parallel>, #tpu.dimension_semantics<parallel>, #tpu.dimension_semantics<arbitrary>], iteration_bounds = array<i64: 1, 1, 2>, scalar_prefetch = 0 : i64, scratch_operands = 1 : i64, tpu.core_type = #tpu.core_type<tc>, window_params = [{transform_indices = @transform_0, window_bounds = array<i64: 16, 128>}, {transform_indices = @transform_1, window_bounds = array<i64: 128, 128>}, {transform_indices = @transform_2, window_bounds = array<i64: 1, 128>}, {transform_indices = @transform_3, window_bounds = array<i64: 16, 128>}]} {
    %c0_i32 = arith.constant 0 : i32
    %0 = arith.cmpi eq, %arg2, %c0_i32 : i32
    %1 = arith.extui %0 : i1 to i32
    %c0_i32_0 = arith.constant 0 : i32
    %2 = arith.cmpi ne, %1, %c0_i32_0 : i32
    scf.if %2 {
      %cst_9 = arith.constant 0.000000e+00 : f32
      %12 = vector.broadcast %cst_9 : f32 to vector<16x128xf32>
      %c0_10 = arith.constant 0 : index
      %c0_11 = arith.constant 0 : index
      %13 = vector.load %arg7[%c0_10, %c0_11] : memref<16x128xf32, #tpu.memory_space<vmem>>, vector<16x128xf32>
      tpu.vector_store %arg7[%c0_10, %c0_11], %12 {strides = array<i32>} : memref<16x128xf32, #tpu.memory_space<vmem>>, vector<16x128xf32>,
    } else {
    }
    %c0 = arith.constant 0 : index
    %c0_1 = arith.constant 0 : index
    %3 = vector.load %arg7[%c0, %c0_1] : memref<16x128xf32, #tpu.memory_space<vmem>>, vector<16x128xf32>
    %c0_2 = arith.constant 0 : index
    %c0_3 = arith.constant 0 : index
    %4 = vector.load %arg3[%c0_2, %c0_3] : memref<16x128xf32, #tpu.memory_space<vmem>>, vector<16x128xf32>
    %c0_4 = arith.constant 0 : index
    %c0_5 = arith.constant 0 : index
    %5 = vector.load %arg4[%c0_4, %c0_5] : memref<128x128xf32, #tpu.memory_space<vmem>>, vector<128x128xf32>
    %cst = arith.constant dense<0.000000e+00> : vector<16x128xf32>
    %6 = tpu.matmul %4, %5, %cst {dimension_numbers = #tpu.dot_dimension_numbers<[1], [0], [0], [1], [0, 0, 1, 1], [], []>} : vector<16x128xf32>, vector<128x128xf32>, vector<16x128xf32> -> vector<16x128xf32>
    %7 = arith.addf %3, %6 : vector<16x128xf32>
    %c0_6 = arith.constant 0 : index
    %c0_7 = arith.constant 0 : index
    %8 = vector.load %arg7[%c0_6, %c0_7] : memref<16x128xf32, #tpu.memory_space<vmem>>, vector<16x128xf32>
    tpu.vector_store %arg7[%c0_6, %c0_7], %7 {strides = array<i32>} : memref<16x128xf32, #tpu.memory_space<vmem>>, vector<16x128xf32>,
    %c1_i32 = arith.constant 1 : i32
    %9 = arith.cmpi eq, %arg2, %c1_i32 : i32
    %10 = arith.extui %9 : i1 to i32
    %c0_i32_8 = arith.constant 0 : i32
    %11 = arith.cmpi ne, %10, %c0_i32_8 : i32
    scf.if %11 {
      %c0_9 = arith.constant 0 : index
      %c0_10 = arith.constant 0 : index
      %12 = vector.load %arg7[%c0_9, %c0_10] : memref<16x128xf32, #tpu.memory_space<vmem>>, vector<16x128xf32>
      %c0_11 = arith.constant 0 : index
      %c0_12 = arith.constant 0 : index
      %13 = vector.load %arg5[%c0_11, %c0_12] : memref<1x128xf32, #tpu.memory_space<vmem>>, vector<1x128xf32>
      %14 = vector.broadcast %13 : vector<1x128xf32> to vector<16x128xf32>
      %15 = arith.addf %12, %14 : vector<16x128xf32>
      %c0_13 = arith.constant 0 : index
      %c0_14 = arith.constant 0 : index
      %16 = vector.load %arg6[%c0_13, %c0_14] : memref<16x128xf32, #tpu.memory_space<vmem>>, vector<16x128xf32>
      tpu.vector_store %arg6[%c0_13, %c0_14], %15 {strides = array<i32>} : memref<16x128xf32, #tpu.memory_space<vmem>>, vector<16x128xf32>,
    } else {
    }
    return
  }
  func.func @transform_0(%arg0: i32, %arg1: i32, %arg2: i32) -> (i32, i32) {
    %c0_i32 = arith.constant 0 : i32
    return %arg0, %arg2 : i32, i32
  }
  func.func @transform_1(%arg0: i32, %arg1: i32, %arg2: i32) -> (i32, i32) {
    %c0_i32 = arith.constant 0 : i32
    return %arg2, %arg1 : i32, i32
  }
  func.func @transform_2(%arg0: i32, %arg1: i32, %arg2: i32) -> (i32, i32) {
    %c0_i32 = arith.constant 0 : i32
    %c0_i32_0 = arith.constant 0 : i32
    return %c0_i32, %arg1 : i32, i32
  }
  func.func @transform_3(%arg0: i32, %arg1: i32, %arg2: i32) -> (i32, i32) {
    %c0_i32 = arith.constant 0 : i32
    return %arg0, %arg1 : i32, i32
  }
}

</mosaic_0001>

<bundles_post_ra>
// kernel: tpu_custom_call.1
= control target key start
LH: loop header
LB: loop body
LE: loop exit
PB: predicated region body
PF: predicated region fallthrough
CT: control target
= control target key end

     0   :  { %8 = vsyncpa [#allocation4], 0  ;;  %s989_s0 = inlined_call_operand.hbm [shape: f32[16,256], index: 0, kind: input, shape index: {}]   ;;  %s990_s1 = inlined_call_operand.hbm [shape: f32[256,128], index: 1, kind: input, shape index: {}]   ;;  %s991_s2 = inlined_call_operand.vmem [shape: f32[1,128], index: 2, kind: input, shape index: {}]   ;;  %s992_s3 = inlined_call_operand.hbm [shape: f32[16,128], index: 3, kind: output, shape index: {}]  }
   0x1   :  { %10 = vsyncpa [#allocation4 + $0x1], 0 }
   0x2   :  { %11 = vsyncpa [#allocation7], 0 }
   0x3   :  { %13 = vsyncpa [#allocation7 + $0x1], 0 }
   0x4   :  { %14 = vsyncpa [#allocation5], 0  ;;  %s822_s12 = smov 0   ;;  %s824_s13 = smov 0  }
   0x5   :  { %s826_s14 = smov 0   ;;  %s828_s15 = smov 0  }
   0x6   :  { %s830_s16 = smov 0   ;;  %s832_s17 = smov 0  }
   0x7 LB: > { %s507_s18 = sadd.s32 4294967295, %s791_s17   ;;  %s32_s19 = sadd.s32 1, %s787_s16  ;;  %s791_s17 = sphi %s832_s17, %s20_s17   ;;  %s787_s16 = sphi %s830_s16, %s1002_s16   ;;  %s783_s15 = sphi %s828_s15, %s1001_s15   ;;  %s779_s14 = sphi %s826_s14, %s1000_s14   ;;  %s775_s13 = sphi %s824_s13, %s999_s13   ;;  %s771_s12 = sphi %s822_s12, %s998_s12  }
   0x8   : > { %p33_p0 = scmp.ge.s32.totalorder %s32_s19, 2  ;;  %s48_s20 = sadd.s32 1, %s779_s14 }
   0x9   : > { %p55_p1 = scmp.ne.s32.totalorder %s779_s14, %s775_s13  ;;  %p56_p2 = scmp.eq.s32.totalorder %s791_s17, 0 }
   0xa   : > { %s1004_s19 = smov (%p33_p0, %s32_s19), 0  ;;  %p61_p4 = scmp.ne.s32.totalorder %s775_s13, %s771_s12 }
   0xb   : > { %p858_p3 = por %p56_p2, %p55_p1  ;;  %s44_s22 = ssub.s32 %s787_s16, %s1004_s19 }
   0xc   : > { %p62_p5 = scmp.eq.s32.totalorder %s507_s18, 0  ;;  %p46_p6 = scmp.eq.s32.totalorder %s44_s22, 0 }
   0xd   : > { %p595_p8 = scmp.lt.s32.totalorder %s791_s17, 2  ;;  %s876_s25 = sand.u32 1, %s779_s14  }
   0xe   : > { %p867_p7 = por %p62_p5, %p61_p4  ;;  %s512_s26 = sshll.u32 %s787_s16, 7 }
   0xf   : > { %s873_s24 = scalar_select %p46_p6, %s779_s14, %s48_s20  }
  0x10   : > { %s511_s27 = sshll.u32 %s876_s25, 4  ;;  %s185_s30 = scalar_lea.hbm %s989_s0, %s512_s26 }
  0x11   : > { %s177_s4 = scalar_lea.vmem [#allocation3], %s511_s27  ;;  %p885_p9 = pnand %p595_p8, %p858_p3 }
  0x12   : > { %s186_s5 = sshll.u32 %s177_s4, 4  ;;  %p516_p10 = scmp.ge.s32.totalorder %s791_s17, 1  ;;  %s187_s5 = int_to_ptr.vmem [resolvable:$true] %s186_s5 }
  0x13   : > { %s174_s7 = scalar_lea.sflag [#allocation4], %s876_s25  ;;  %p655_p11 = pneg %p885_p9 }
  0x14   : > { %s666_s8 = scalar_lea.vmem %s187_s5, 256  ;;  %s793_s9 = smov [#allocation3]  }
  0x15   : > { %p667_p12 = scmp.ne.s32.totalorder %s187_s5, %s666_s8  ;;  %s671_s10 = sshll.u32 %s793_s9, 4  ;;  %s672_s10 = int_to_ptr.vmem [resolvable:$false] %s671_s10 }
  0x16   : > { %s673_s11 = scalar_lea.vmem %s672_s10, 512  ;;  %p674_p1 = scmp.lt.s32.totalorder %s187_s5, %s672_s10 }
  0x17   : > { %p669_p13 = pnand %p667_p12, %p655_p11  ;;  %p675_p2 = scmp.lt.s32.totalorder %s673_s11, %s666_s8 }
  0x19   : > { %p670_p0 = pneg %p669_p13  ;;  %p676_p3 = por %p675_p2, %p674_p1 }
  0x1b   : > { %p677_p4 = pnand %p676_p3, %p670_p0 }
  0x1d   : > { %680 = shalt.err (!%p677_p4)
}
  0x1e   : > { %s794_s12 = smov 256   ;;  %s795_s20 = smov 128  }
  0x1f   : > { %s796_s21 = smov 8   ;;  %p216_p5 = scmp.lt.s32.totalorder %s791_s17, 3 }
  0x20   : > { %591 = dma.hbm_to_vmem [thread:$0]  (!%p885_p9), %s185_s30, 256, %s187_s5, %s174_s7, %s794_s12, %s795_s20, %s796_s21  }
  0x21   : > { %s513_s22 = sshll.u32 %s876_s25, 7  ;;  %s526_s26 = sshll.u32 %s787_s16, 11 }
  0x22   : > { %p903_p6 = pnand %p516_p10, %p216_p5  ;;  %s207_s4 = scalar_lea.hbm %s990_s1, %s526_s26 }
  0x23   : > { %s200_s8 = scalar_lea.vmem [#allocation6], %s513_s22  ;;  %s197_s10 = scalar_lea.sflag [#allocation7], %s876_s25 }
  0x24   : > { %s208_s9 = sshll.u32 %s200_s8, 4  ;;  %s797_s30 = smov [#allocation6]   ;;  %s209_s9 = int_to_ptr.vmem [resolvable:$true] %s208_s9 }
  0x25   : > { %s694_s11 = scalar_lea.vmem %s209_s9, 2048  ;;  %s699_s5 = sshll.u32 %s797_s30, 4  ;;  %s700_s5 = int_to_ptr.vmem [resolvable:$false] %s699_s5 }
  0x26   : > { %p695_p8 = scmp.ne.s32.totalorder %s209_s9, %s694_s11  ;;  %s701_s7 = scalar_lea.vmem %s700_s5, 4096 }
  0x27   : > { %p702_p10 = scmp.lt.s32.totalorder %s209_s9, %s700_s5  ;;  %p703_p0 = scmp.lt.s32.totalorder %s701_s7, %s694_s11 }
  0x28   : > { %p697_p12 = pnand %p695_p8, %p655_p11 }
  0x29   : > { %p704_p1 = por %p703_p0, %p702_p10 }
  0x2a   : > { %p698_p13 = pneg %p697_p12 }
  0x2c   : > { %p705_p2 = pnand %p704_p1, %p698_p13 }
  0x2e   : > { %708 = shalt.err (!%p705_p2)
}
  0x2f   : > { %594 = dma.hbm_to_vmem [thread:$0]  (!%p885_p9), %s207_s4, 2048, %s209_s9, %s197_s10, %s795_s20, %s795_s20, %s796_s21  }
  0x30   : > { %220 = sbr.rel (%p903_p6) target bundleno = 323 (0x143), region = 32  ;;  %s222_s25 = sand.u32 (!%p903_p6), 1, %s775_s13  }
  0x31   : > { %s517_s12 = sshll.u32 (!%p903_p6), %s222_s25, 4  ;;  %s223_s22 = scalar_lea.sflag (!%p903_p6), [#allocation4], %s222_s25 }
  0x32   : > { %s919_s26 = scalar_lea.vmem (!%p903_p6), [#allocation3], %s517_s12 }
  0x35   : > { %758 = dma.done.wait (%p867_p7), %s223_s22, 256  }
  0x36   : > { %760 = vsyncadd (%p867_p7), %s223_s22, 4294967040  ;;  %s518_s28 = sshll.u32 %s222_s25, 7  ;;  %s232_s29 = scalar_lea.sflag [#allocation7], %s222_s25 }
  0x37   : > { %s925_s6 = scalar_lea.vmem [#allocation6], %s518_s28 }
  0x38   : > { %762 = dma.done.wait (%p867_p7), %s232_s29, 2048  }
  0x39   : > { %764 = vsyncadd (%p867_p7), %s232_s29, 4294965248  ;;  %p519_p9 = scmp.ne.s32.totalorder %s783_s15, 0 }
  0x3b   : > { %270 = sbr.rel (%p519_p9) target bundleno = 66 (0x42), region = 44 }
  0x40   : > { %v798_v0 = vmov 0.0  }
  0x41   : > { %271 = vst [vmem:[#allocation2] sm:$0xff] %v798_v0  ;;  %272 = vst [vmem:[#allocation2 + $0x8] sm:$0xff] %v798_v0 }
  0x42 PF: > { %v292_v1 = vld [vmem:[%s925_s6 + $0x78] sm:$0xff]  ;;  %v291_v2 = vld [vmem:[%s925_s6 + $0x70] sm:$0xff]  ;;  %v290_v3 = vld [vmem:[%s925_s6 + $0x68] sm:$0xff]  ;;  %p520_p7 = scmp.ne.s32.totalorder %s783_s15, 1 }
  0x43   : > { %545 = vmatprep.subr.mxu0 %v292_v1  ;;  %v289_v4 = vld [vmem:[%s925_s6 + $0x60] sm:$0xff]  ;;  %v288_v6 = vld [vmem:[%s925_s6 + $0x58] sm:$0xff]  ;;  %v287_v7 = vld [vmem:[%s925_s6 + $0x50] sm:$0xff] }
  0x44   : > { %546 = vmatpush3.msra.mxu0 %v292_v1  ;;  %v275_v5 = vld [vmem:[%s919_s26] sm:$0xff]  ;;  %v286_v8 = vld [vmem:[%s925_s6 + $0x48] sm:$0xff]  ;;  %v284_v10 = vld [vmem:[%s925_s6 + $0x38] sm:$0xff] }
  0x45   : > { %547 = vmatprep.subr.mxu0 %v291_v2  ;;  %577 = vmatprep.mubr.f32.mxu0 %v275_v5  ;;  %v285_v9 = vld [vmem:[%s925_s6 + $0x40] sm:$0xff]  ;;  %v283_v11 = vld [vmem:[%s925_s6 + $0x30] sm:$0xff]  ;;  %v282_v12 = vld [vmem:[%s925_s6 + $0x28] sm:$0xff] }
  0x46   : > { %548 = vmatpush3.msra.mxu0 %v291_v2  ;;  %v281_v13 = vld [vmem:[%s925_s6 + $0x20] sm:$0xff]  ;;  %v280_v14 = vld [vmem:[%s925_s6 + $0x18] sm:$0xff]  ;;  %v279_v15 = vld [vmem:[%s925_s6 + $0x10] sm:$0xff] }
  0x47   : > { %549 = vmatprep.subr.mxu0 %v290_v3  ;;  %v278_v16 = vld [vmem:[%s925_s6 + $0x8] sm:$0xff]  ;;  %v277_v17 = vld [vmem:[%s925_s6] sm:$0xff] }
  0x48   : > { %550 = vmatpush3.msra.mxu0 %v290_v3  ;;  %v276_v18 = vld [vmem:[%s919_s26 + $0x8] sm:$0xff]  ;;  %v273_v21 = vld [vmem:[#allocation2] sm:$0xff] }
  0x49   : > { %551 = vmatprep.subr.mxu0 %v289_v4  ;;  %v274_v19 = vld [vmem:[#allocation2 + $0x8] sm:$0xff] }
  0x4a   : > { %552 = vmatpush3.msra.mxu0 %v289_v4 }
  0x4b   : > { %553 = vmatprep.subr.mxu0 %v288_v6 }
  0x4c   : > { %554 = vmatpush3.msra.mxu0 %v288_v6 }
  0x4d   : > { %555 = vmatprep.subr.mxu0 %v287_v7 }
  0x4e   : > { %556 = vmatpush3.msra.mxu0 %v287_v7 }
  0x4f   : > { %557 = vmatprep.subr.mxu0 %v286_v8 }
  0x50   : > { %558 = vmatpush3.msra.mxu0 %v286_v8 }
  0x51   : > { %559 = vmatprep.subr.mxu0 %v285_v9 }
  0x52   : > { %560 = vmatpush3.msra.mxu0 %v285_v9 }
  0x53   : > { %561 = vmatprep.subr.mxu0 %v284_v10 }
  0x54   : > { %562 = vmatpush3.msra.mxu0 %v284_v10 }
  0x55   : > { %563 = vmatprep.subr.mxu0 %v283_v11 }
  0x56   : > { %564 = vmatpush3.msra.mxu0 %v283_v11 }
  0x57   : > { %565 = vmatprep.subr.mxu0 %v282_v12 }
  0x58   : > { %566 = vmatpush3.msra.mxu0 %v282_v12 }
  0x59   : > { %567 = vmatprep.subr.mxu0 %v281_v13 }
  0x5a   : > { %568 = vmatpush3.msra.mxu0 %v281_v13 }
  0x5b   : > { %569 = vmatprep.subr.mxu0 %v280_v14 }
  0x5c   : > { %570 = vmatpush3.msra.mxu0 %v280_v14 }
  0x5d   : > { %571 = vmatprep.subr.mxu0 %v279_v15 }
  0x5e   : > { %572 = vmatpush3.msra.mxu0 %v279_v15 }
  0x5f   : > { %573 = vmatprep.subr.mxu0 %v278_v16 }
  0x60   : > { %574 = vmatpush3.msra.mxu0 %v278_v16 }
  0x61   : > { %575 = vmatprep.subr.mxu0 %v277_v17 }
  0x62   : > { %576 = vmatpush3.msra.mxu0 %v277_v17 }
  0x63   : > { %578 = vmatmul.mubr.f32.vlgmr.msra.gmra.mxu0 %v276_v18 }
 0x123   : > { %v579_v20 = vpop.f32.mrf.mxu0 }
 0x124   : > { %v369_v22 = vadd.f32 %v579_v20, %v274_v19  ;;  %375 = sbr.rel (%p520_p7) target bundleno = 307 (0x133), region = 48 }
 0x125   : > { %v359_v23 = vpop.f32.mrf.mxu0 }
 0x126   : > { %371 = vst [vmem:[#allocation2 + $0x8] sm:$0xff] %v369_v22  ;;  %v368_v24 = vadd.f32 %v359_v23, %v273_v21 }
 0x128   : > { %370 = vst [vmem:[#allocation2] sm:$0xff] %v368_v24 }
 0x129   : > { %v521_v26 = vld [vmem:[%s991_s2] ss:$0 sm:$0xff] }
 0x12d   : > { %v377_v27 = vld [vmem:[#allocation2 + $0x8] sm:$0xff] }
 0x12e   : > { %v386_v29 = vadd.f32 %v521_v26, %v377_v27 }
 0x12f   : > { %v376_v25 = vld [vmem:[#allocation2] sm:$0xff] }
 0x130   : > { %v385_v28 = vadd.f32 %v521_v26, %v376_v25  ;;  %388 = vst [vmem:[#allocation8 + $0x8] sm:$0xff] %v386_v29 }
 0x132   : > { %387 = vst [vmem:[#allocation8] sm:$0xff] %v385_v28 }
 0x133 PF: > { %p956_p11 = scmp.eq.s32.totalorder %s507_s18, 1  ;;  %s799_s15 = smov [#allocation8]  }
 0x134   : > { %s399_s27 = sshll.u32 %s799_s15, 4  ;;  %s400_s27 = int_to_ptr.vmem [resolvable:$true] %s399_s27 }
 0x135   : > { %s709_s4 = scalar_lea.vmem %s400_s27, 256  ;;  %p716_p6 = scmp.lt.s32.totalorder %s400_s27, %s400_s27 }
 0x136   : > { %p710_p3 = scmp.ne.s32.totalorder %s400_s27, %s709_s4  ;;  %p717_p8 = scmp.lt.s32.totalorder %s709_s4, %s709_s4 }
 0x138   : > { %p711_p4 = pnand %p710_p3, %p956_p11  ;;  %p718_p12 = por %p717_p8, %p716_p6 }
 0x13a   : > { %p712_p5 = pneg %p711_p4 }
 0x13c   : > { %p719_p13 = pnand %p718_p12, %p712_p5 }
 0x13e   : > { %722 = shalt.err (!%p719_p13)
}
 0x13f   : > { %s800_s8 = smov 128   ;;  %s801_s18 = smov 8  }
 0x140   : > { %585 = dma.vmem_to_hbm [thread:$0]  (%p956_p11), %s400_s27, 256, %s992_s3, [#allocation5], %s800_s8, %s800_s8, %s801_s18  }
 0x141   : > { %766 = dma.done.wait (%p956_p11), [#allocation5], 256  }
 0x142   : > { %768 = vsyncadd (%p956_p11), [#allocation5], 4294967040 }
 0x143 PF: > { %s20_s17 = sadd.s32 1, %s791_s17   ;;  %s998_s12 = smov %s775_s13 }
 0x144   : > { %p17_p10 = scmp.ge.s32.totalorder %s20_s17, 4   ;;  %s999_s13 = smov %s779_s14 }
 0x145   : > { %s1000_s14 = smov %s873_s24  ;;  %s1001_s15 = smov %s787_s16 }
 0x146   : > { %s1002_s16 = smov %s1004_s19  ;;  %19 = sbr.rel (!%p17_p10) target bundleno = 7 (0x7), region = 94 }
 0x14b   :  { %415 = vsyncpa [#allocation4], 1 }
 0x14c   :  { %417 = vsyncpa [#allocation4 + $0x1], 1 }
 0x14d   :  { %418 = vsyncpa [#allocation7], 1 }
 0x14e   :  { %420 = vsyncpa [#allocation7 + $0x1], 1 }
 0x14f   :  { %421 = vsyncpa [#allocation5], 1 }
 0x150   :  { %423 = vsyncpa [#allocation5 + $0x1], 1 }

</bundles_post_ra>
